<compile_context>
chip_gen: v5e
topology: v5e:2x2
jax: 0.10.0
libtpu: 0.0.40
codegen_flags: <defaults>
</compile_context>

<pallas_src>
import functools
import math

import jax
import jax.numpy as jnp
from jax.experimental import pallas as pl
from jax.experimental.pallas import tpu as pltpu

_INV_SQRT2 = 1.0 / math.sqrt(2.0)


def projection_head_kernel(x_ref, w1_ref, b1_ref, w2_ref, b2_ref,
                           gamma_ref, beta_ref, o_ref, *, eps, p_real, padded):
    # x / w1 / w2 are in the matmul dtype (f32 here; bf16 in production).
    x = x_ref[...]

    # projected = Linear(embedding_dim -> projection_dim)(x); f32 accumulation on MXU.
    projected = jnp.dot(x, w1_ref[...], preferred_element_type=jnp.float32)
    projected = projected + b1_ref[...]

    # GELU (exact / erf variant, matching torch.nn.GELU default) in f32 on the VPU.
    h = 0.5 * projected * (1.0 + jax.lax.erf(projected * _INV_SQRT2))

    # fc = Linear(projection_dim -> projection_dim); f32 accumulation on MXU.
    y = jnp.dot(h.astype(w2_ref.dtype), w2_ref[...],
                preferred_element_type=jnp.float32)
    y = y + b2_ref[...]

    # Dropout in eval mode is the identity.
    # TODO(synk): training-mode dropout (pltpu.prng_seed / prng_random_bits mask) not implemented.

    # residual
    y = y + projected

    # LayerNorm over the REAL projection dim only. Padded lanes of y are exactly zero
    # (zero-padded weights/biases), so sum(y) already equals the sum over real lanes;
    # the variance additionally masks the padded lanes.
    inv_p = 1.0 / float(p_real)
    mean = jnp.sum(y, axis=-1, keepdims=True) * inv_p
    diff = y - mean
    if padded:
        lane = jax.lax.broadcasted_iota(jnp.int32, y.shape, 1)
        diff = jnp.where(lane < p_real, diff, 0.0)
    var = jnp.sum(diff * diff, axis=-1, keepdims=True) * inv_p
    out = diff * jax.lax.rsqrt(var + eps) * gamma_ref[...] + beta_ref[...]

    o_ref[...] = out.astype(o_ref.dtype)


def projection_head(x, w1, b1, w2, b2, gamma, beta, *, eps=1e-5,
                    block_b=None, matmul_dtype=None):
    """x: (B, E); w1: (E, P); w2: (P, P); b1/b2/gamma/beta: (P,). Returns (B, P)."""
    B, E = x.shape
    P = w1.shape[1]
    assert w1.shape == (E, P) and w2.shape == (P, P)
    assert b1.shape == (P,) and b2.shape == (P,)
    assert gamma.shape == (P,) and beta.shape == (P,)

    if matmul_dtype is None:
        matmul_dtype = x.dtype           # pass jnp.bfloat16 here for production shapes
    out_dtype = x.dtype
    mm_b = jnp.dtype(matmul_dtype).itemsize
    out_b = jnp.dtype(out_dtype).itemsize

    # ---- lane-dense output: pad the projection dim up to a multiple of 128 ----
    P_pad = ((P + 127) // 128) * 128
    padded_lanes = P_pad != P

    # ---- resident (grid-invariant) footprint: W1, W2, biases, LN params ----
    resident = (E * P_pad + P_pad * P_pad) * mm_b + 4 * P_pad * 4

    # ---- batch tiling: one big block for small B, <=256-row tiles otherwise ----
    if block_b is None:
        block_b = 256 if B >= 256 else ((B + 7) // 8) * 8
        # shrink tile if double-buffered x/out tiles + residents blow the VMEM budget
        budget = 96 << 20
        def tile_bytes(bb):
            return 2 * bb * E * mm_b + 2 * bb * P_pad * out_b
        while block_b > 8 and resident + tile_bytes(block_b) > budget:
            block_b //= 2
        block_b = max(8, ((block_b + 7) // 8) * 8)
    B_pad = ((B + block_b - 1) // block_b) * block_b

    x_in = x.astype(matmul_dtype)
    if B_pad != B:
        x_in = jnp.pad(x_in, ((0, B_pad - B), (0, 0)))

    def pad_cols(a):
        return jnp.pad(a, ((0, 0), (0, P_pad - P))) if padded_lanes else a

    w1_p = pad_cols(w1).astype(matmul_dtype)
    w2_p = w2
    if padded_lanes:
        w2_p = jnp.pad(w2, ((0, P_pad - P), (0, P_pad - P)))
    w2_p = w2_p.astype(matmul_dtype)

    # biases / LN params kept in f32 (elementwise math stays f32, cheap to DMA)
    b1_p = pad_cols(b1.reshape(1, P)).astype(jnp.float32)
    b2_p = pad_cols(b2.reshape(1, P)).astype(jnp.float32)
    g_p = pad_cols(gamma.reshape(1, P)).astype(jnp.float32)
    bt_p = pad_cols(beta.reshape(1, P)).astype(jnp.float32)

    # ---- explicit VMEM budget (double-buffered x/out tiles + resident weights) ----
    vmem_needed = (
        2 * block_b * E * mm_b                      # x tile (double buffered)
        + 2 * block_b * P_pad * out_b               # out tile (double buffered)
        + 2 * resident                              # weights/biases (constant index)
        + 4 * block_b * P_pad * 4                   # f32 intermediates headroom
    )
    vmem_limit = min(120 << 20, max(16 << 20, int(1.25 * vmem_needed) + (2 << 20)))

    kernel = functools.partial(projection_head_kernel, eps=float(eps),
                               p_real=P, padded=padded_lanes)

    out = pl.pallas_call(
        kernel,
        out_shape=jax.ShapeDtypeStruct((B_pad, P_pad), out_dtype),
        grid_spec=pltpu.PrefetchScalarGridSpec(
            num_scalar_prefetch=0,
            grid=(B_pad // block_b,),
            in_specs=[
                pl.BlockSpec((block_b, E), lambda i: (i, 0)),      # x tile
                pl.BlockSpec((E, P_pad), lambda i: (0, 0)),        # W1 (resident)
                pl.BlockSpec((1, P_pad), lambda i: (0, 0)),        # b1
                pl.BlockSpec((P_pad, P_pad), lambda i: (0, 0)),    # W2 (resident)
                pl.BlockSpec((1, P_pad), lambda i: (0, 0)),        # b2
                pl.BlockSpec((1, P_pad), lambda i: (0, 0)),        # LN gamma
                pl.BlockSpec((1, P_pad), lambda i: (0, 0)),        # LN beta
            ],
            out_specs=pl.BlockSpec((block_b, P_pad), lambda i: (i, 0)),
        ),
        compiler_params=pltpu.CompilerParams(
            dimension_semantics=("parallel",),
            vmem_limit_bytes=vmem_limit,
        ),
    )(x_in, w1_p, b1_p, w2_p, b2_p, g_p, bt_p)

    return out[:B, :P]


def reference(x, w1, b1, w2, b2, gamma, beta, eps=1e-5):
    projected = x @ w1 + b1
    h = 0.5 * projected * (1.0 + jax.lax.erf(projected / jnp.sqrt(2.0)))
    y = h @ w2 + b2
    y = y + projected
    mean = y.mean(-1, keepdims=True)
    var = ((y - mean) ** 2).mean(-1, keepdims=True)
    return (y - mean) / jnp.sqrt(var + eps) * gamma + beta


if __name__ == "__main__":
    # small shapes consistent with the module: batch=16, embedding_dim=32, projection_dim=64
    B, E, P = 16, 32, 64
    key = jax.random.PRNGKey(0)
    kx, kw1, kb1, kw2, kb2 = jax.random.split(key, 5)

    x = jax.random.normal(kx, (B, E), dtype=jnp.float32)

    # deterministic synthetic parameter init (Linear weights stored as (in, out))
    w1 = jax.random.normal(kw1, (E, P), dtype=jnp.float32) * (1.0 / jnp.sqrt(E))
    b1 = jax.random.normal(kb1, (P,), dtype=jnp.float32) * 0.01
    w2 = jax.random.normal(kw2, (P, P), dtype=jnp.float32) * (1.0 / jnp.sqrt(P))
    b2 = jax.random.normal(kb2, (P,), dtype=jnp.float32) * 0.01
    gamma = jnp.ones((P,), dtype=jnp.float32)
    beta = jnp.zeros((P,), dtype=jnp.float32)

    out = projection_head(x, w1, b1, w2, b2, gamma, beta)
    out = jax.block_until_ready(out)

    ref = reference(x, w1, b1, w2, b2, gamma, beta)
    assert out.shape == (B, P)
    assert jnp.allclose(out, ref, atol=1e-4, rtol=1e-4), "mismatch vs reference"

    print("KERNEL_OK")
</pallas_src>

<mosaic_0001>
module attributes {stable_mosaic.version = 11 : i64} {
  func.func @projection_head_kernel(%arg0: i32, %arg1: memref<16x32xf32, #tpu.memory_space<vmem>>, %arg2: memref<32x128xf32, #tpu.memory_space<vmem>>, %arg3: memref<1x128xf32, #tpu.memory_space<vmem>>, %arg4: memref<128x128xf32, #tpu.memory_space<vmem>>, %arg5: memref<1x128xf32, #tpu.memory_space<vmem>>, %arg6: memref<1x128xf32, #tpu.memory_space<vmem>>, %arg7: memref<1x128xf32, #tpu.memory_space<vmem>>, %arg8: memref<16x128xf32, #tpu.memory_space<vmem>>) attributes {dimension_semantics = [#tpu.dimension_semantics<parallel>], iteration_bounds = array<i64: 1>, scalar_prefetch = 0 : i64, scratch_operands = 0 : i64, tpu.core_type = #tpu.core_type<tc>, window_params = [{transform_indices = @transform_0, window_bounds = array<i64: 16, 32>}, {pipeline_mode = #tpu.pipeline_mode<synchronous>, transform_indices = @transform_1, window_bounds = array<i64: 32, 128>}, {pipeline_mode = #tpu.pipeline_mode<synchronous>, transform_indices = @transform_2, window_bounds = array<i64: 1, 128>}, {pipeline_mode = #tpu.pipeline_mode<synchronous>, transform_indices = @transform_3, window_bounds = array<i64: 128, 128>}, {pipeline_mode = #tpu.pipeline_mode<synchronous>, transform_indices = @transform_4, window_bounds = array<i64: 1, 128>}, {pipeline_mode = #tpu.pipeline_mode<synchronous>, transform_indices = @transform_5, window_bounds = array<i64: 1, 128>}, {pipeline_mode = #tpu.pipeline_mode<synchronous>, transform_indices = @transform_6, window_bounds = array<i64: 1, 128>}, {transform_indices = @transform_7, window_bounds = array<i64: 16, 128>}]} {
    %c0 = arith.constant 0 : index
    %c0_0 = arith.constant 0 : index
    %0 = vector.load %arg1[%c0, %c0_0] : memref<16x32xf32, #tpu.memory_space<vmem>>, vector<16x32xf32>
    %c0_1 = arith.constant 0 : index
    %c0_2 = arith.constant 0 : index
    %1 = vector.load %arg2[%c0_1, %c0_2] : memref<32x128xf32, #tpu.memory_space<vmem>>, vector<32x128xf32>
    %cst = arith.constant dense<0.000000e+00> : vector<16x128xf32>
    %2 = tpu.matmul %0, %1, %cst {dimension_numbers = #tpu.dot_dimension_numbers<[1], [0], [0], [1], [0, 0, 1, 1], [], []>} : vector<16x32xf32>, vector<32x128xf32>, vector<16x128xf32> -> vector<16x128xf32>
    %c0_3 = arith.constant 0 : index
    %c0_4 = arith.constant 0 : index
    %3 = vector.load %arg3[%c0_3, %c0_4] : memref<1x128xf32, #tpu.memory_space<vmem>>, vector<1x128xf32>
    %4 = vector.broadcast %3 : vector<1x128xf32> to vector<16x128xf32>
    %5 = arith.addf %2, %4 : vector<16x128xf32>
    %cst_5 = arith.constant 5.000000e-01 : f32
    %6 = vector.broadcast %cst_5 : f32 to vector<16x128xf32>
    %7 = arith.mulf %6, %5 : vector<16x128xf32>
    %cst_6 = arith.constant 0.707106769 : f32
    %8 = vector.broadcast %cst_6 : f32 to vector<16x128xf32>
    %9 = arith.mulf %5, %8 : vector<16x128xf32>
    %10 = math.erf %9 : vector<16x128xf32>
    %cst_7 = arith.constant 1.000000e+00 : f32
    %11 = vector.broadcast %cst_7 : f32 to vector<16x128xf32>
    %12 = arith.addf %11, %10 : vector<16x128xf32>
    %13 = arith.mulf %7, %12 : vector<16x128xf32>
    %c0_8 = arith.constant 0 : index
    %c0_9 = arith.constant 0 : index
    %14 = vector.load %arg4[%c0_8, %c0_9] : memref<128x128xf32, #tpu.memory_space<vmem>>, vector<128x128xf32>
    %cst_10 = arith.constant dense<0.000000e+00> : vector<16x128xf32>
    %15 = tpu.matmul %13, %14, %cst_10 {dimension_numbers = #tpu.dot_dimension_numbers<[1], [0], [0], [1], [0, 0, 1, 1], [], []>} : vector<16x128xf32>, vector<128x128xf32>, vector<16x128xf32> -> vector<16x128xf32>
    %c0_11 = arith.constant 0 : index
    %c0_12 = arith.constant 0 : index
    %16 = vector.load %arg5[%c0_11, %c0_12] : memref<1x128xf32, #tpu.memory_space<vmem>>, vector<1x128xf32>
    %17 = vector.broadcast %16 : vector<1x128xf32> to vector<16x128xf32>
    %18 = arith.addf %15, %17 : vector<16x128xf32>
    %19 = arith.addf %18, %5 : vector<16x128xf32>
    %cst_13 = arith.constant dense<0.000000e+00> : vector<16xf32>
    %20 = vector.multi_reduction <add>, %19, %cst_13 [1] : vector<16x128xf32> to vector<16xf32>
    %21 = vector.shape_cast %20 : vector<16xf32> to vector<16x1xf32>
    %cst_14 = arith.constant 1.562500e-02 : f32
    %22 = vector.broadcast %cst_14 : f32 to vector<16x1xf32>
    %23 = arith.mulf %21, %22 : vector<16x1xf32>
    %24 = vector.broadcast %23 : vector<16x1xf32> to vector<16x128xf32>
    %25 = arith.subf %19, %24 : vector<16x128xf32>
    %26 = tpu.iota {dimensions = array<i32: 1>} : vector<16x128xi32>
    %c64_i32 = arith.constant 64 : i32
    %27 = vector.broadcast %c64_i32 : i32 to vector<16x128xi32>
    %28 = arith.cmpi slt, %26, %27 : vector<16x128xi32>
    %cst_15 = arith.constant 0.000000e+00 : f32
    %29 = vector.broadcast %cst_15 : f32 to vector<16x128xf32>
    %30 = arith.select %28, %25, %29 : vector<16x128xi1>, vector<16x128xf32>
    %31 = arith.mulf %30, %30 : vector<16x128xf32>
    %cst_16 = arith.constant dense<0.000000e+00> : vector<16xf32>
    %32 = vector.multi_reduction <add>, %31, %cst_16 [1] : vector<16x128xf32> to vector<16xf32>
    %33 = vector.shape_cast %32 : vector<16xf32> to vector<16x1xf32>
    %cst_17 = arith.constant 1.562500e-02 : f32
    %34 = vector.broadcast %cst_17 : f32 to vector<16x1xf32>
    %35 = arith.mulf %33, %34 : vector<16x1xf32>
    %cst_18 = arith.constant 9.99999974E-6 : f32
    %36 = vector.broadcast %cst_18 : f32 to vector<16x1xf32>
    %37 = arith.addf %35, %36 : vector<16x1xf32>
    %38 = math.rsqrt %37 : vector<16x1xf32>
    %39 = vector.broadcast %38 : vector<16x1xf32> to vector<16x128xf32>
    %40 = arith.mulf %30, %39 : vector<16x128xf32>
    %c0_19 = arith.constant 0 : index
    %c0_20 = arith.constant 0 : index
    %41 = vector.load %arg6[%c0_19, %c0_20] : memref<1x128xf32, #tpu.memory_space<vmem>>, vector<1x128xf32>
    %42 = vector.broadcast %41 : vector<1x128xf32> to vector<16x128xf32>
    %43 = arith.mulf %40, %42 : vector<16x128xf32>
    %c0_21 = arith.constant 0 : index
    %c0_22 = arith.constant 0 : index
    %44 = vector.load %arg7[%c0_21, %c0_22] : memref<1x128xf32, #tpu.memory_space<vmem>>, vector<1x128xf32>
    %45 = vector.broadcast %44 : vector<1x128xf32> to vector<16x128xf32>
    %46 = arith.addf %43, %45 : vector<16x128xf32>
    %c0_23 = arith.constant 0 : index
    %c0_24 = arith.constant 0 : index
    %47 = vector.load %arg8[%c0_23, %c0_24] : memref<16x128xf32, #tpu.memory_space<vmem>>, vector<16x128xf32>
    tpu.vector_store %arg8[%c0_23, %c0_24], %46 {strides = array<i32>} : memref<16x128xf32, #tpu.memory_space<vmem>>, vector<16x128xf32>,
    return
  }
  func.func @transform_0(%arg0: i32) -> (i32, i32) {
    %c0_i32 = arith.constant 0 : i32
    %c0_i32_0 = arith.constant 0 : i32
    return %arg0, %c0_i32 : i32, i32
  }
  func.func @transform_1(%arg0: i32) -> (i32, i32) {
    %c0_i32 = arith.constant 0 : i32
    %c0_i32_0 = arith.constant 0 : i32
    %c0_i32_1 = arith.constant 0 : i32
    return %c0_i32, %c0_i32_0 : i32, i32
  }
  func.func @transform_2(%arg0: i32) -> (i32, i32) {
    %c0_i32 = arith.constant 0 : i32
    %c0_i32_0 = arith.constant 0 : i32
    %c0_i32_1 = arith.constant 0 : i32
    return %c0_i32, %c0_i32_0 : i32, i32
  }
  func.func @transform_3(%arg0: i32) -> (i32, i32) {
    %c0_i32 = arith.constant 0 : i32
    %c0_i32_0 = arith.constant 0 : i32
    %c0_i32_1 = arith.constant 0 : i32
    return %c0_i32, %c0_i32_0 : i32, i32
  }
  func.func @transform_4(%arg0: i32) -> (i32, i32) {
    %c0_i32 = arith.constant 0 : i32
    %c0_i32_0 = arith.constant 0 : i32
    %c0_i32_1 = arith.constant 0 : i32
    return %c0_i32, %c0_i32_0 : i32, i32
  }
  func.func @transform_5(%arg0: i32) -> (i32, i32) {
    %c0_i32 = arith.constant 0 : i32
    %c0_i32_0 = arith.constant 0 : i32
    %c0_i32_1 = arith.constant 0 : i32
    return %c0_i32, %c0_i32_0 : i32, i32
  }
  func.func @transform_6(%arg0: i32) -> (i32, i32) {
    %c0_i32 = arith.constant 0 : i32
    %c0_i32_0 = arith.constant 0 : i32
    %c0_i32_1 = arith.constant 0 : i32
    return %c0_i32, %c0_i32_0 : i32, i32
  }
  func.func @transform_7(%arg0: i32) -> (i32, i32) {
    %c0_i32 = arith.constant 0 : i32
    %c0_i32_0 = arith.constant 0 : i32
    return %arg0, %c0_i32 : i32, i32
  }
}

</mosaic_0001>

<bundles_post_ra>
// kernel: tpu_custom_call.1
= control target key start
LH: loop header
LB: loop body
LE: loop exit
PB: predicated region body
PF: predicated region fallthrough
CT: control target
= control target key end

     0   :  { %12 = vsyncpa [#allocation3], 0  ;;  %s568_s0 = inlined_call_operand.hbm [shape: f32[16,32], index: 0, kind: input, shape index: {}]   ;;  %s569_s1 = inlined_call_operand.hbm [shape: f32[32,128], index: 1, kind: input, shape index: {}]   ;;  %s570_s2 = inlined_call_operand.vmem [shape: f32[1,128], index: 2, kind: input, shape index: {}]   ;;  %s571_s3 = inlined_call_operand.hbm [shape: f32[128,128], index: 3, kind: input, shape index: {}]   ;;  %s572_s4 = inlined_call_operand.vmem [shape: f32[1,128], index: 4, kind: input, shape index: {}]   ;;  %s573_s5 = inlined_call_operand.vmem [shape: f32[1,128], index: 5, kind: input, shape index: {}]   ;;  %s574_s6 = inlined_call_operand.vmem [shape: f32[1,128], index: 6, kind: input, shape index: {}]   ;;  %s575_s7 = inlined_call_operand.hbm [shape: f32[16,128], index: 7, kind: output, shape index: {}]  }
   0x1   :  { %13 = vsyncpa [#allocation6], 0 }
   0x2   :  { %14 = vsyncpa [#allocation4], 0  ;;  %s32_s26 = sshll.u32 %s569_s1, 4  ;;  %s466_s27 = smov [#allocation5]   ;;  %s33_s26 = int_to_ptr.hbm [resolvable:$true] %s32_s26 }
   0x3   :  { %s34_s28 = sshll.u32 %s466_s27, 4  ;;  %s19_s8 = sshll.u32 %s568_s0, 4  ;;  %s35_s28 = int_to_ptr.vmem [resolvable:$true] %s34_s28  ;;  %s20_s8 = int_to_ptr.hbm [resolvable:$true] %s19_s8 }
   0x4   :  { %s467_s9 = smov 128   ;;  %s468_s10 = smov 8  }
   0x5   :  { %40 = dma.hbm_to_vmem [thread:$0]  %s33_s26, 512, %s35_s28, [#allocation6], %s467_s9, %s467_s9, %s468_s10  }
   0x6   :  { %s469_s11 = smov [#allocation2]   ;;  %s47_s1 = sshll.u32 %s571_s3, 4  ;;  %s48_s1 = int_to_ptr.hbm [resolvable:$true] %s47_s1 }
   0x7   :  { %s21_s12 = sshll.u32 %s469_s11, 4  ;;  %s470_s0 = smov [#allocation7]   ;;  %s22_s12 = int_to_ptr.vmem [resolvable:$true] %s21_s12 }
   0x8   :  { %27 = dma.hbm_to_vmem [thread:$0]  %s20_s8, 256, %s22_s12, [#allocation3], %s467_s9, %s467_s9, %s468_s10  }
   0x9   :  { %s49_s15 = sshll.u32 %s470_s0, 4  ;;  %s50_s15 = int_to_ptr.vmem [resolvable:$true] %s49_s15 }
   0xa   :  { %55 = dma.hbm_to_vmem [thread:$0]  %s48_s1, 2048, %s50_s15, [#allocation6], %s467_s9, %s467_s9, %s468_s10  }
   0xb   :  { %460 = dma.done.wait [#allocation3], 256  }
   0xc   :  { %461 = vsyncadd [#allocation3], 4294967040 }
   0xd   :  { %462 = dma.done.wait [#allocation6], 2560  }
   0xe   :  { %463 = vsyncadd [#allocation6], 4294964736  ;;  %v79_v0 = vld [vmem:[#allocation5 + $0x18] sm:$0xff]  ;;  %v78_v1 = vld [vmem:[#allocation5 + $0x10] sm:$0xff]  ;;  %vm84_vm0 = vcmask 261120  }
   0xf   :  { %103 = vmatpush.msra.mxu0 %v79_v0  ;;  %v77_v2 = vld [vmem:[#allocation5 + $0x8] sm:$0xff]  ;;  %v76_v3 = vld [vmem:[#allocation5] sm:$0xff]  ;;  %v74_v4 = vld [vmem:[#allocation2] sm:$0xff] }
  0x10   :  { %v75_v5 = vld [vmem:[#allocation2 + $0x8] sm:$0xff]  ;;  %v216_v7 = vld [vmem:[#allocation7 + $0x70] sm:$0xff]  ;;  %v215_v8 = vld [vmem:[#allocation7 + $0x68] sm:$0xff] }
  0x11   :  { %104 = vmatpush.msra.mxu0 %v78_v1  ;;  %v217_v6 = vld [vmem:[#allocation7 + $0x78] sm:$0xff]  ;;  %v214_v9 = vld [vmem:[#allocation7 + $0x60] sm:$0xff]  ;;  %v212_v11 = vld [vmem:[#allocation7 + $0x50] sm:$0xff] }
  0x12   :  { %222 = vmatpush.msra.mxu1 %v217_v6  ;;  %330 = vmatpush.msra.mxu2 %v217_v6  ;;  %v213_v10 = vld [vmem:[#allocation7 + $0x58] sm:$0xff]  ;;  %v211_v12 = vld [vmem:[#allocation7 + $0x48] sm:$0xff]  ;;  %v210_v13 = vld [vmem:[#allocation7 + $0x40] sm:$0xff] }
  0x13   :  { %105 = vmatpush.msra.mxu0 %v77_v2  ;;  %v352_v14 = vld [vmem:[%s570_s2] ss:$0 sm:$0xff]  ;;  %v209_v15 = vld [vmem:[#allocation7 + $0x38] sm:$0xff]  ;;  %v207_v19 = vld [vmem:[#allocation7 + $0x28] sm:$0xff] }
  0x14   :  { %223 = vmatpush.msra.mxu1 %v216_v7  ;;  %331 = vmatpush.msra.mxu2 %v216_v7  ;;  %v208_v16 = vld [vmem:[#allocation7 + $0x30] sm:$0xff]  ;;  %v206_v21 = vld [vmem:[#allocation7 + $0x20] sm:$0xff]  ;;  %v205_v23 = vld [vmem:[#allocation7 + $0x18] sm:$0xff] }
  0x15   :  { %106 = vmatpush.msra.mxu0 %v76_v3  ;;  %v204_v25 = vld [vmem:[#allocation7 + $0x10] sm:$0xff]  ;;  %v203_v28 = vld [vmem:[#allocation7 + $0x8] sm:$0xff]  ;;  %v202_v31 = vld [vmem:[#allocation7] sm:$0xff] }
  0x16   :  { %326 = vmatmul.msk.f32.vlgmr.msra.gmra.mxu0 %vm84_vm0, %v74_v4  ;;  %224 = vmatpush.msra.mxu1 %v215_v8 }
  0x17   :  { %332 = vmatpush.msra.mxu2 %v215_v8 }
  0x18   :  { %225 = vmatpush.msra.mxu1 %v214_v9 }
  0x19   :  { %333 = vmatpush.msra.mxu2 %v214_v9 }
  0x1a   :  { %226 = vmatpush.msra.mxu1 %v213_v10 }
  0x1b   :  { %334 = vmatpush.msra.mxu2 %v213_v10 }
  0x1c   :  { %227 = vmatpush.msra.mxu1 %v212_v11 }
  0x1d   :  { %335 = vmatpush.msra.mxu2 %v212_v11 }
  0x1e   :  { %327 = vmatmul.msk.f32.gmra.mxu0 %vm84_vm0, %v75_v5  ;;  %228 = vmatpush.msra.mxu1 %v211_v12 }
  0x1f   :  { %336 = vmatpush.msra.mxu2 %v211_v12 }
  0x20   :  { %229 = vmatpush.msra.mxu1 %v210_v13 }
  0x21   :  { %337 = vmatpush.msra.mxu2 %v210_v13 }
  0x22   :  { %230 = vmatpush.msra.mxu1 %v209_v15 }
  0x23   :  { %338 = vmatpush.msra.mxu2 %v209_v15 }
  0x24   :  { %231 = vmatpush.msra.mxu1 %v208_v16 }
  0x25   :  { %339 = vmatpush.msra.mxu2 %v208_v16 }
  0x26   :  { %232 = vmatpush.msra.mxu1 %v207_v19 }
  0x27   :  { %340 = vmatpush.msra.mxu2 %v207_v19 }
  0x28   :  { %233 = vmatpush.msra.mxu1 %v206_v21 }
  0x29   :  { %341 = vmatpush.msra.mxu2 %v206_v21 }
  0x2a   :  { %234 = vmatpush.msra.mxu1 %v205_v23 }
  0x2b   :  { %342 = vmatpush.msra.mxu2 %v205_v23 }
  0x2c   :  { %235 = vmatpush.msra.mxu1 %v204_v25 }
  0x2d   :  { %343 = vmatpush.msra.mxu2 %v204_v25 }
  0x2e   :  { %236 = vmatpush.msra.mxu1 %v203_v28 }
  0x2f   :  { %344 = vmatpush.msra.mxu2 %v203_v28 }
  0x30   :  { %237 = vmatpush.msra.mxu1 %v202_v31 }
  0x31   :  { %345 = vmatpush.msra.mxu2 %v202_v31 }
  0x93   :  { %v108_v17 = vpop.f32.mrf.mxu0 }
  0x94   :  { %v533_v18 = vadd.f32 %v352_v14, %v108_v17 }
  0x96   :  { %v536_v20 = vmul.f32 0.70710677, %v533_v18  ;;  %v114_v31 = vmul.f32 0.5, %v533_v18 }
  0x98   :  { %v118_v22 = vmul.f32 %v536_v20, %v536_v20 }
  0x9a   :  { %v119_v24 = vmin.f32 %v118_v22, 16.0 }
  0x9b   :  { %v111_v26 = vpop.f32.mrf.mxu0 }
  0x9c   :  { %v540_v27 = vadd.f32 %v352_v14, %v111_v26  ;;  %v120_v29 = vmul.f32 2.1237322e-06, %v119_v24  ;;  %v131_v30 = vmul.f32 3.8918573e-05, %v119_v24 }
  0x9e   :  { %v543_v32 = vmul.f32 0.70710677, %v540_v27  ;;  %v121_v33 = vadd.f32 0.00028619796, %v120_v29  ;;  %v132_v34 = vadd.f32 0.001143296, %v131_v30 }
  0xa0   :  { %v158_v35 = vmul.f32 %v543_v32, %v543_v32  ;;  %v122_v36 = vmul.f32 %v121_v33, %v119_v24  ;;  %v133_v37 = vmul.f32 %v132_v34, %v119_v24 }
  0xa2   :  { %v159_v38 = vmin.f32 %v158_v35, 16.0  ;;  %v134_v39 = vadd.f32 0.014752088, %v133_v37  ;;  %v123_v40 = vadd.f32 0.0036580483, %v122_v36 }
  0xa4   :  { %v135_v41 = vmul.f32 %v134_v39, %v119_v24  ;;  %v160_v42 = vmul.f32 2.1237322e-06, %v159_v38  ;;  %v171_v43 = vmul.f32 3.8918573e-05, %v159_v38  ;;  %v124_v46 = vmul.f32 %v123_v40, %v119_v24 }
  0xa6   :  { %v136_v44 = vadd.f32 0.112945676, %v135_v41  ;;  %v161_v45 = vadd.f32 0.00028619796, %v160_v42  ;;  %v172_v47 = vadd.f32 0.001143296, %v171_v43 }
  0xa7   :  { %v125_v52 = vadd.f32 0.05243302, %v124_v46  ;;  %v115_v41 = vmul.f32 0.5, %v540_v27 }
  0xa8   :  { %v137_v48 = vmul.f32 %v136_v44, %v119_v24  ;;  %v162_v49 = vmul.f32 %v161_v45, %v159_v38  ;;  %v173_v50 = vmul.f32 %v172_v47, %v159_v38  ;;  %v353_v44 = vld [vmem:[%s572_s4] ss:$0 sm:$0xff] }
  0xa9   :  { %v126_v58 = vmul.f32 %v125_v52, %v119_v24 }
  0xaa   :  { %v138_v51 = vadd.f32 0.4994258, %v137_v48  ;;  %v174_v53 = vadd.f32 0.014752088, %v173_v50  ;;  %v163_v55 = vadd.f32 0.0036580483, %v162_v49  ;;  %v255_v50 = vlaneseq }
  0xab   :  { %v127_v62 = vadd.f32 0.18741608, %v126_v58 }
  0xac   :  { %v139_v54 = vmul.f32 %v138_v51, %v119_v24  ;;  %v175_v56 = vmul.f32 %v174_v53, %v159_v38  ;;  %v164_v60 = vmul.f32 %v163_v55, %v159_v38  ;;  %v256_v51 = vand.u32 127, %v255_v50 }
  0xad   :  { %v128_v3 = vmul.f32 %v127_v62, %v119_v24 }
  0xae   :  { %v140_v57 = vadd.f32 1.0, %v139_v54  ;;  %v176_v59 = vadd.f32 0.112945676, %v175_v56  ;;  %v165_v0 = vadd.f32 0.05243302, %v164_v60  ;;  %vm257_vm9 = vcmp.lt.s32.totalorder %v256_v51, 64 }
  0xaf   :  { %v129_v9 = vadd.f32 1.1283791, %v128_v3 }
  0xb0   :  { %356 = vrcp.f32 %v140_v57  ;;  %v177_v61 = vmul.f32 %v176_v59, %v159_v38  ;;  %v166_v6 = vmul.f32 %v165_v0, %v159_v38  ;;  %v152_v8 = vand.u32 2147483648, %v140_v57 }
  0xb1   :  { %v150_v11 = vand.u32 2147483647, %v140_v57  ;;  %vm146_vm2 = vweird.f32 %v140_v57  ;;  %v130_v16 = vmul.f32 %v129_v9, %v536_v20 }
  0xb2   :  { %v178_v63 = vadd.f32 0.4994258, %v177_v61  ;;  %v167_v12 = vadd.f32 0.18741608, %v166_v6  ;;  %v153_v14 = vor.u32 1.1754944e-38, %v152_v8 }
  0xb3   :  { %vm151_vm4 = vcmp.eq.f32.partialorder %v150_v11, 8.507059e+37  ;;  %v354_v8 = vld [vmem:[%s573_s5] ss:$0 sm:$0xff]  ;;  %s471_s5 = smov [#allocation8]  }
  0xb4   :  { %v179_v1 = vmul.f32 %v178_v63, %v159_v38  ;;  %v168_v21 = vmul.f32 %v167_v12, %v159_v38  ;;  %v355_v11 = vld [vmem:[%s574_s6] ss:$0 sm:$0xff]  ;;  %s310_s21 = sshll.u32 %s471_s5, 4  ;;  %s312_s6 = sshll.u32 %s575_s7, 4  ;;  %s311_s21 = int_to_ptr.vmem [resolvable:$true] %s310_s21  ;;  %s313_s6 = int_to_ptr.hbm [resolvable:$true] %s312_s6 }
  0xb6   :  { %v357_v2 = vpop.eup %356  ;;  %v180_v5 = vadd.f32 1.0, %v179_v1  ;;  %v169_v28 = vadd.f32 1.1283791, %v168_v21 }
  0xb7   :  { %v142_v4 = vmul.f32 %v357_v2, %v140_v57  ;;  %vm147_vm1 = vweird.f32 %v357_v2 }
  0xb8   :  { %358 = vrcp.f32 %v180_v5  ;;  %vm148_vm3 = vmor %vm146_vm2, %vm147_vm1  ;;  %v192_v26 = vand.u32 2147483648, %v180_v5  ;;  %v190_v30 = vand.u32 2147483647, %v180_v5  ;;  %vm186_vm6 = vweird.f32 %v180_v5 }
  0xb9   :  { %v143_v7 = vsub.f32 1.0, %v142_v4  ;;  %v170_v36 = vmul.f32 %v169_v28, %v543_v32 }
  0xba   :  { %v193_v20 = vor.u32 1.1754944e-38, %v192_v26  ;;  %vm191_vm8 = vcmp.eq.f32.partialorder %v190_v30, 8.507059e+37 }
  0xbb   :  { %v144_v10 = vmul.f32 %v357_v2, %v143_v7 }
  0xbd   :  { %v145_v13 = vadd.f32 %v357_v2, %v144_v10 }
  0xbe   :  { %v359_v15 = vpop.eup %358 }
  0xbf   :  { %v149_v17 = vsel %vm148_vm3, %v357_v2, %v145_v13  ;;  %v182_v22 = vmul.f32 %v359_v15, %v180_v5  ;;  %vm187_vm5 = vweird.f32 %v359_v15 }
  0xc0   :  { %v154_v19 = vsel %vm151_vm4, %v153_v14, %v149_v17  ;;  %vm188_vm7 = vmor %vm186_vm6, %vm187_vm5 }
  0xc1   :  { %v155_v23 = vmul.f32 %v154_v19, %v130_v16  ;;  %v183_v24 = vsub.f32 1.0, %v182_v22 }
  0xc3   :  { %v328_v25 = vclamps-f32 %v155_v23, 1.0  ;;  %v184_v29 = vmul.f32 %v359_v15, %v183_v24 }
  0xc5   :  { %v198_v33 = vadd.f32 1.0, %v328_v25  ;;  %v185_v34 = vadd.f32 %v359_v15, %v184_v29 }
  0xc7   :  { %v200_v35 = vmul.f32 %v198_v33, %v114_v31  ;;  %v189_v37 = vsel %vm188_vm7, %v359_v15, %v185_v34 }
  0xc8   :  { %v194_v38 = vsel %vm191_vm8, %v193_v20, %v189_v37 }
  0xc9   :  { %238 = vmatmul.f32.vlgmr.msra.gmra.mxu1 %v200_v35  ;;  %v195_v39 = vmul.f32 %v194_v38, %v170_v36 }
  0xcb   :  { %v329_v40 = vclamps-f32 %v195_v39, 1.0 }
  0xcd   :  { %v199_v42 = vadd.f32 1.0, %v329_v40 }
  0xcf   :  { %v201_v43 = vmul.f32 %v199_v42, %v115_v41 }
  0xd1   :  { %241 = vmatmul.f32.vlgmr.msra.gmra.mxu2 %v201_v43 }
 0x146   :  { %v239_v45 = vpop.f32.mrf.mxu1 }
 0x147   :  { %v240_v46 = vadd.f32 %v353_v44, %v239_v45 }
 0x149   :  { %v245_v47 = vadd.f32 %v240_v46, %v533_v18 }
 0x14b   :  { %247 = vadd.xlane.f32.xlu0 %v245_v47 }
 0x154   :  { %v242_v32 = vpop.f32.mrf.mxu2 }
 0x155   :  { %v243_v48 = vadd.f32 %v353_v44, %v242_v32 }
 0x157   :  { %v246_v49 = vadd.f32 %v243_v48, %v540_v27 }
 0x159   :  { %249 = vadd.xlane.f32.xlu0 %v246_v49 }
 0x1be   :  { %v248_v52 = vpop.xlane.xlu0 %247 }
 0x1bf   :  { %v251_v53 = vmul.f32 0.015625, %v248_v52 }
 0x1c1   :  { %v253_v54 = vsub.f32 %v245_v47, %v251_v53 }
 0x1c3   :  { %v258_v55 = vsel %vm257_vm9, %v253_v54, 0.0 }
 0x1c4   :  { %v260_v56 = vmul.f32 %v258_v55, %v258_v55 }
 0x1c6   :  { %262 = vadd.xlane.f32.xlu1 %v260_v56 }
 0x1cc   :  { %v250_v57 = vpop.xlane.xlu0 %249 }
 0x1cd   :  { %v252_v58 = vmul.f32 0.015625, %v250_v57 }
 0x1cf   :  { %v254_v59 = vsub.f32 %v246_v49, %v252_v58 }
 0x1d1   :  { %v259_v60 = vsel %vm257_vm9, %v254_v59, 0.0 }
 0x1d2   :  { %v261_v18 = vmul.f32 %v259_v60, %v259_v60 }
 0x1d4   :  { %264 = vadd.xlane.f32.xlu1 %v261_v18 }
 0x239   :  { %v263_v61 = vpop.xlane.xlu1 %262 }
 0x23a   :  { %v266_v62 = vmul.f32 0.015625, %v263_v61 }
 0x23c   :  { %v268_v63 = vadd.f32 1e-05, %v266_v62 }
 0x23e   :  { %360 = vrsqrt.f32 %v268_v63  ;;  %vm276_vm11 = vweird.f32 %v268_v63 }
 0x244   :  { %v361_v27 = vpop.eup %360 }
 0x245   :  { %v271_v0 = vmul.f32 %v361_v27, %v268_v63  ;;  %vm277_vm10 = vweird.f32 %v361_v27 }
 0x246   :  { %vm278_vm12 = vmor %vm276_vm11, %vm277_vm10 }
 0x247   :  { %v272_v1 = vmul.f32 %v361_v27, %v271_v0  ;;  %v265_v2 = vpop.xlane.xlu1 %264 }
 0x248   :  { %v267_v4 = vmul.f32 0.015625, %v265_v2 }
 0x249   :  { %v273_v3 = vmul.f32 0.5, %v272_v1 }
 0x24a   :  { %v269_v6 = vadd.f32 1e-05, %v267_v4 }
 0x24b   :  { %v274_v5 = vsub.f32 1.5, %v273_v3 }
 0x24c   :  { %362 = vrsqrt.f32 %v269_v6  ;;  %vm286_vm14 = vweird.f32 %v269_v6 }
 0x24d   :  { %v275_v7 = vmul.f32 %v361_v27, %v274_v5 }
 0x24f   :  { %v279_v9 = vsel %vm278_vm12, %v361_v27, %v275_v7 }
 0x250   :  { %v290_v10 = vmul.f32 %v279_v9, %v258_v55 }
 0x252   :  { %v296_v12 = vmul.f32 %v354_v8, %v290_v10  ;;  %v363_v13 = vpop.eup %362 }
 0x253   :  { %v281_v14 = vmul.f32 %v363_v13, %v269_v6  ;;  %vm287_vm13 = vweird.f32 %v363_v13 }
 0x254   :  { %v302_v15 = vadd.f32 %v355_v11, %v296_v12  ;;  %vm288_vm15 = vmor %vm286_vm14, %vm287_vm13 }
 0x255   :  { %v282_v16 = vmul.f32 %v363_v13, %v281_v14 }
 0x256   :  { %304 = vst [vmem:[#allocation8] sm:$0xff] %v302_v15 }
 0x257   :  { %v283_v17 = vmul.f32 0.5, %v282_v16 }
 0x259   :  { %v284_v19 = vsub.f32 1.5, %v283_v17 }
 0x25b   :  { %v285_v21 = vmul.f32 %v363_v13, %v284_v19 }
 0x25d   :  { %v289_v22 = vsel %vm288_vm15, %v363_v13, %v285_v21 }
 0x25e   :  { %v291_v23 = vmul.f32 %v289_v22, %v259_v60 }
 0x260   :  { %v297_v24 = vmul.f32 %v354_v8, %v291_v23 }
 0x262   :  { %v303_v25 = vadd.f32 %v355_v11, %v297_v24 }
 0x264   :  { %305 = vst [vmem:[#allocation8 + $0x8] sm:$0xff] %v303_v25 }
 0x265   :  { %318 = dma.vmem_to_hbm [thread:$0]  %s311_s21, 256, %s313_s6, [#allocation4], %s467_s9, %s467_s9, %s468_s10  }
 0x266   :  { %464 = dma.done.wait [#allocation4], 256  }
 0x267   :  { %465 = vsyncadd [#allocation4], 4294967040 }
 0x268   :  { %323 = vsyncpa [#allocation3], 1 }
 0x269   :  { %324 = vsyncpa [#allocation6], 1 }
 0x26a   :  { %325 = vsyncpa [#allocation4], 1 }

</bundles_post_ra>
